<compile_context>
chip_gen: v5e
topology: v5e:2x2
jax: 0.10.0
libtpu: 0.0.40
codegen_flags: <defaults>
</compile_context>

<pallas_src>
import math
from functools import partial

import jax
import jax.numpy as jnp
from jax import lax
from jax.experimental import pallas as pl
from jax.experimental.pallas import tpu as pltpu

_LANE = 128          # TPU vreg lane width
_MAX_TILE_G = 2048   # packed rows per block: 2048 * 128 * 4B = 1 MiB out tile


def _round_up(a, b):
    return (a + b - 1) // b * b


def _channel_pos_emb_kernel(freq, num_steps, pack, x_ref, c_ref, o_ref):
    # x_ref: (TILE_G, pack) f32   -- pack logical rows per packed row
    # c_ref: (1, pack * S)  f32   -- centers tiled `pack` times along lanes
    # o_ref: (TILE_G, pack * S) f32
    tile_g, lane_w = o_ref.shape
    c = c_ref[...]                                            # (1, L)

    if pack == 1:
        xb = x_ref[...]                                       # (TILE_G, 1) -> bcast
    else:
        # Lane l belongs to logical-row group l // S; groups are contiguous
        # ascending, so threshold compares on a lane iota select the right
        # x column without an integer divide.
        lane = lax.broadcasted_iota(jnp.int32, (tile_g, lane_w), 1)
        xb = x_ref[:, 0:1]                                    # group 0 value
        for g in range(1, pack):
            xb = jnp.where(lane >= g * num_steps, x_ref[:, g:g + 1], xb)

    scaled = (xb - c) * freq
    emb = jnp.cos(scaled)
    emb = emb * emb
    # Exact semantics: strict > pi/2 mask written as exact 0.0 (matches PyTorch).
    o_ref[...] = jnp.where(jnp.abs(scaled) > (0.5 * math.pi), 0.0, emb).astype(
        o_ref.dtype
    )


class ChannelPosEmb:
    """JAX/Pallas port of the PyTorch ChannelPosEmb module."""

    def __init__(self, start=-1.0, end=1.0, num_steps=32):
        self.centers = jnp.linspace(start, end, num_steps, dtype=jnp.float32)
        self.frequency = float(0.25 * math.pi * (num_steps / (end - start)))
        self.num_steps = int(num_steps)

        # Pack multiple logical rows per 128-lane vreg row when S divides 128.
        if self.num_steps < _LANE and _LANE % self.num_steps == 0:
            self._pack = _LANE // self.num_steps
        else:
            self._pack = 1
        self._lane_w = self.num_steps * self._pack
        self._centers_tiled = jnp.tile(self.centers, self._pack).reshape(
            1, self._lane_w
        )

    # ---- Pallas path -------------------------------------------------------
    def _pallas_forward(self, x):
        n = x.shape[0]
        pack, lane_w, s = self._pack, self._lane_w, self.num_steps

        g = pl.cdiv(n, pack)                    # packed rows needed
        nt = pl.cdiv(g, _MAX_TILE_G)            # grid steps
        tile_g = _round_up(pl.cdiv(g, nt), 8)   # sublane-aligned tile
        padded_g = nt * tile_g                  # waste bounded by ~8*nt rows
        padded_n = padded_g * pack

        x_pad = jnp.pad(x, (0, padded_n - n)) if padded_n != n else x
        x_packed = x_pad.reshape(padded_g, pack)    # compact, dense HBM read

        out_packed = pl.pallas_call(
            partial(_channel_pos_emb_kernel, self.frequency, s, pack),
            out_shape=jax.ShapeDtypeStruct((padded_g, lane_w), jnp.float32),
            grid=(nt,),
            in_specs=[
                pl.BlockSpec((tile_g, pack), lambda i: (i, 0)),
                pl.BlockSpec((1, lane_w), lambda i: (0, 0)),
            ],
            out_specs=pl.BlockSpec((tile_g, lane_w), lambda i: (i, 0)),
            compiler_params=pltpu.CompilerParams(
                dimension_semantics=("parallel",),
            ),
        )(x_packed, self._centers_tiled)

        # (padded_G, pack*S) row-major == (padded_G*pack, S): a free view.
        return out_packed.reshape(padded_n, s)[:n]

    # ---- plain-XLA path (tiny inputs) --------------------------------------
    def _jnp_forward(self, x):
        scaled = (x[:, None] - self.centers[None, :]) * self.frequency
        emb = jnp.cos(scaled) ** 2
        return jnp.where(jnp.abs(scaled) > 0.5 * math.pi, 0.0, emb)

    def __call__(self, x, use_pallas=None):
        x = jnp.asarray(x, dtype=jnp.float32)
        assert x.ndim == 1, "ChannelPosEmb expects a 1-D input, like the PyTorch module"
        if use_pallas is None:
            # Below a few thousand rows, kernel-launch overhead dominates; let
            # XLA fuse it instead.
            use_pallas = x.shape[0] >= 4096
        return self._pallas_forward(x) if use_pallas else self._jnp_forward(x)


if __name__ == "__main__":
    key = jax.random.PRNGKey(0)
    k_small, k_big = jax.random.split(key)

    mod = ChannelPosEmb(start=-1.0, end=1.0, num_steps=32)

    # Small demo input (N=8); force the Pallas path so the kernel is exercised.
    x_small = jax.random.uniform(
        k_small, (8,), dtype=jnp.float32, minval=-1.2, maxval=1.2
    )
    out_small = jax.block_until_ready(mod(x_small, use_pallas=True))
    ref_small = mod._jnp_forward(x_small)
    assert out_small.shape == (8, 32)
    assert jnp.allclose(out_small, ref_small, atol=1e-5, rtol=1e-5)

    # Second check: odd N exercising padding + a non-trivial block size.
    x_big = jax.random.uniform(
        k_big, (5003,), dtype=jnp.float32, minval=-1.3, maxval=1.3
    )
    out_big = jax.block_until_ready(mod(x_big, use_pallas=True))
    ref_big = mod._jnp_forward(x_big)
    assert out_big.shape == (5003, 32)
    assert jnp.allclose(out_big, ref_big, atol=1e-5, rtol=1e-5)

    # Third check: multi-tile grid (several grid steps, megacore-parallel axis).
    x_multi = jax.random.uniform(
        jax.random.PRNGKey(1), (20000,), dtype=jnp.float32, minval=-1.3, maxval=1.3
    )
    out_multi = jax.block_until_ready(mod(x_multi, use_pallas=True))
    ref_multi = mod._jnp_forward(x_multi)
    assert out_multi.shape == (20000, 32)
    assert jnp.allclose(out_multi, ref_multi, atol=1e-5, rtol=1e-5)

    print("KERNEL_OK")
</pallas_src>

<mosaic_0001>
module attributes {stable_mosaic.version = 11 : i64} {
  func.func @_channel_pos_emb_kernel(%arg0: i32, %arg1: memref<8x4xf32, #tpu.memory_space<vmem>>, %arg2: memref<1x128xf32, #tpu.memory_space<vmem>>, %arg3: memref<8x128xf32, #tpu.memory_space<vmem>>) attributes {dimension_semantics = [#tpu.dimension_semantics<parallel>], iteration_bounds = array<i64: 1>, scalar_prefetch = 0 : i64, scratch_operands = 0 : i64, tpu.core_type = #tpu.core_type<tc>, window_params = [{transform_indices = @transform_0, window_bounds = array<i64: 8, 4>}, {pipeline_mode = #tpu.pipeline_mode<synchronous>, transform_indices = @transform_1, window_bounds = array<i64: 1, 128>}, {transform_indices = @transform_2, window_bounds = array<i64: 8, 128>}]} {
    %c0 = arith.constant 0 : index
    %c0_0 = arith.constant 0 : index
    %0 = vector.load %arg2[%c0, %c0_0] : memref<1x128xf32, #tpu.memory_space<vmem>>, vector<1x128xf32>
    %1 = tpu.iota {dimensions = array<i32: 1>} : vector<8x128xi32>
    %c0_1 = arith.constant 0 : index
    %c0_2 = arith.constant 0 : index
    %2 = vector.load %arg1[%c0_1, %c0_2] : memref<8x4xf32, #tpu.memory_space<vmem>>, vector<8x1xf32>
    %c32_i32 = arith.constant 32 : i32
    %3 = vector.broadcast %c32_i32 : i32 to vector<8x128xi32>
    %4 = arith.cmpi sge, %1, %3 : vector<8x128xi32>
    %c0_3 = arith.constant 0 : index
    %c1 = arith.constant 1 : index
    %5 = vector.load %arg1[%c0_3, %c1] : memref<8x4xf32, #tpu.memory_space<vmem>>, vector<8x1xf32>
    %6 = vector.shape_cast %5 : vector<8x1xf32> to vector<8x1xf32>
    %7 = vector.broadcast %6 : vector<8x1xf32> to vector<8x128xf32>
    %8 = vector.shape_cast %2 : vector<8x1xf32> to vector<8x1xf32>
    %9 = vector.broadcast %8 : vector<8x1xf32> to vector<8x128xf32>
    %10 = arith.select %4, %7, %9 : vector<8x128xi1>, vector<8x128xf32>
    %c64_i32 = arith.constant 64 : i32
    %11 = vector.broadcast %c64_i32 : i32 to vector<8x128xi32>
    %12 = arith.cmpi sge, %1, %11 : vector<8x128xi32>
    %c0_4 = arith.constant 0 : index
    %c2 = arith.constant 2 : index
    %13 = vector.load %arg1[%c0_4, %c2] : memref<8x4xf32, #tpu.memory_space<vmem>>, vector<8x1xf32>
    %14 = vector.shape_cast %13 : vector<8x1xf32> to vector<8x1xf32>
    %15 = vector.broadcast %14 : vector<8x1xf32> to vector<8x128xf32>
    %16 = arith.select %12, %15, %10 : vector<8x128xi1>, vector<8x128xf32>
    %c96_i32 = arith.constant 96 : i32
    %17 = vector.broadcast %c96_i32 : i32 to vector<8x128xi32>
    %18 = arith.cmpi sge, %1, %17 : vector<8x128xi32>
    %c0_5 = arith.constant 0 : index
    %c3 = arith.constant 3 : index
    %19 = vector.load %arg1[%c0_5, %c3] : memref<8x4xf32, #tpu.memory_space<vmem>>, vector<8x1xf32>
    %20 = vector.shape_cast %19 : vector<8x1xf32> to vector<8x1xf32>
    %21 = vector.broadcast %20 : vector<8x1xf32> to vector<8x128xf32>
    %22 = arith.select %18, %21, %16 : vector<8x128xi1>, vector<8x128xf32>
    %23 = vector.broadcast %0 : vector<1x128xf32> to vector<8x128xf32>
    %24 = arith.subf %22, %23 : vector<8x128xf32>
    %cst = arith.constant 12.566371 : f32
    %25 = vector.broadcast %cst : f32 to vector<8x128xf32>
    %26 = arith.mulf %24, %25 : vector<8x128xf32>
    %27 = math.cos %26 : vector<8x128xf32>
    %28 = arith.mulf %27, %27 : vector<8x128xf32>
    %29 = math.absf %26 : vector<8x128xf32>
    %cst_6 = arith.constant 1.57079637 : f32
    %30 = vector.broadcast %cst_6 : f32 to vector<8x128xf32>
    %31 = arith.cmpf ogt, %29, %30 : vector<8x128xf32>
    %cst_7 = arith.constant 0.000000e+00 : f32
    %32 = vector.broadcast %cst_7 : f32 to vector<8x128xf32>
    %33 = arith.select %31, %32, %28 : vector<8x128xi1>, vector<8x128xf32>
    %c0_8 = arith.constant 0 : index
    %c0_9 = arith.constant 0 : index
    %34 = vector.load %arg3[%c0_8, %c0_9] : memref<8x128xf32, #tpu.memory_space<vmem>>, vector<8x128xf32>
    tpu.vector_store %arg3[%c0_8, %c0_9], %33 {strides = array<i32>} : memref<8x128xf32, #tpu.memory_space<vmem>>, vector<8x128xf32>,
    return
  }
  func.func @transform_0(%arg0: i32) -> (i32, i32) {
    %c0_i32 = arith.constant 0 : i32
    %c0_i32_0 = arith.constant 0 : i32
    return %arg0, %c0_i32 : i32, i32
  }
  func.func @transform_1(%arg0: i32) -> (i32, i32) {
    %c0_i32 = arith.constant 0 : i32
    %c0_i32_0 = arith.constant 0 : i32
    %c0_i32_1 = arith.constant 0 : i32
    return %c0_i32, %c0_i32_0 : i32, i32
  }
  func.func @transform_2(%arg0: i32) -> (i32, i32) {
    %c0_i32 = arith.constant 0 : i32
    %c0_i32_0 = arith.constant 0 : i32
    return %arg0, %c0_i32 : i32, i32
  }
}

</mosaic_0001>

<bundles_post_ra>
// kernel: tpu_custom_call.1
= control target key start
LH: loop header
LB: loop body
LE: loop exit
PB: predicated region body
PF: predicated region fallthrough
CT: control target
= control target key end

     0   :  { %v265_v1 = vmov 1   ;;  %v266_v2 = vmov 2   ;;  %s362_s0 = inlined_call_operand.vmem [shape: f32[8,4], index: 0, kind: input, shape index: {}]   ;;  %s363_s1 = inlined_call_operand.vmem [shape: f32[1,128], index: 1, kind: input, shape index: {}]   ;;  %s364_s2 = inlined_call_operand.hbm [shape: f32[8,128], index: 2, kind: output, shape index: {}]  }
   0x1   :  { %v15_v0 = vld [vmem:[%s362_s0] sm:$0xff]  ;;  %233 = vset.pattern.permute.xlu0 %v265_v1  ;;  %235 = vset.pattern.permute.xlu1 %v266_v2 }
   0x2   :  { %7 = vsyncpa [#allocation3], 0  ;;  %19 = vperm.xlu0 %233, %v15_v0   ;;  %29 = vperm.xlu1 %235, %v15_v0   ;;  %v267_v3 = vmov 0   ;;  %v268_v4 = vmov 3   ;;  %v13_v5 = vlaneseq  ;;  %v238_v11 = vld [vmem:[%s363_s1] ss:$0 sm:$0xff] }
   0x3   :  { %v269_v28 = vmov 683565275   ;;  %v270_v30 = vmov 2475754826   ;;  %v271_v33 = vmov 2131351028  }
   0x4   :  { %v14_v8 = vand.u32 127, %v13_v5  ;;  %v272_v36 = vmov 2102212464   ;;  %v273_v39 = vmov 920167782   ;;  %s275_s1 = smov [#allocation2]  }
   0x5   :  { %v274_v42 = vmov 1326507024   ;;  %s208_s12 = sshll.u32 %s275_s1, 4  ;;  %s210_s15 = sshll.u32 %s364_s2, 4  ;;  %s209_s12 = int_to_ptr.vmem [resolvable:$true] %s208_s12  ;;  %s211_s15 = int_to_ptr.hbm [resolvable:$true] %s210_s15 }
   0x6   :  { %vm16_vm0 = vcmp.ge.s32.totalorder %v14_v8, 32  ;;  %vm27_vm1 = vcmp.ge.s32.totalorder %v14_v8, 64  ;;  %vm33_vm2 = vcmp.ge.s32.totalorder %v14_v8, 96 }
   0xa   :  { %234 = vset.pattern.permute.xlu0 %v267_v3  ;;  %236 = vset.pattern.permute.xlu1 %v268_v4 }
   0xb   :  { %23 = vperm.xlu0 %234, %v15_v0   ;;  %35 = vperm.xlu1 %236, %v15_v0  }
  0x13   :  { %237 = vset.pattern.permute.xlu0 %v268_v4 }
  0x74   :  { %v20_v6 = vpop.permute.xlu0 %19  ;;  %v30_v7 = vpop.permute.xlu1 %29 }
  0x7d   :  { %v24_v9 = vpop.permute.xlu0 %23  ;;  %v36_v10 = vpop.permute.xlu1 %35 }
  0x7e   :  { %v26_v12 = vsel %vm16_vm0, %v20_v6, %v24_v9 }
  0x7f   :  { %v32_v13 = vsel %vm27_vm1, %v30_v7, %v26_v12 }
  0x80   :  { %v38_v14 = vsel %vm33_vm2, %v36_v10, %v32_v13 }
  0x81   :  { %v42_v15 = vsub.f32 %v38_v14, %v238_v11 }
  0x83   :  { %v298_v16 = vmul.f32 12.566371, %v42_v15 }
  0x85   :  { %v47_v17 = vand.u32 2139095040, %v298_v16  ;;  %v302_v20 = vand.u32 2147483647, %v298_v16  ;;  %vm46_vm15 = vcmp.lt.s32.totalorder %v298_v16, 0 }
  0x87   :  { %v48_v18 = vshrl.u32 %v47_v17, 23  ;;  %v51_v23 = vand.u32 8388607, %v302_v20  ;;  %vm45_vm0 = vcmp.le.f32.partialorder %v302_v20, 0.7853982 }
  0x89   :  { %v219_v19 = vadd.s32 4294967169, %v48_v18  ;;  %v52_v27 = vor.u32 8388608, %v51_v23 }
  0x8b   :  { %v54_v21 = vadd.s32 1, %v219_v19  ;;  %v316_v49 = vshll.u32 %v52_v27, 8 }
  0x8d   :  { %vm55_vm3 = vcmp.gt.s32.totalorder %v54_v21, 0  ;;  %v93_v58 = vand.u32 65535, %v316_v49  ;;  %v94_v59 = vshrl.u32 %v316_v49, 16 }
  0x8e   :  { %v56_v22 = vsel %vm55_vm3, %v54_v21, 0 }
  0x8f   :  { %v58_v24 = vand.u32 31, %v56_v22  ;;  %v307_v26 = vshrl.u32 %v56_v22, 5 }
  0x91   :  { %v305_v25 = vsub.s32 32, %v58_v24  ;;  %v61_v29 = vshll.u32 %v269_v28, %v58_v24  ;;  %v64_v31 = vshll.u32 %v270_v30, %v58_v24  ;;  %v67_v35 = vshll.u32 %v271_v33, %v58_v24 }
  0x92   :  { %v70_v38 = vshll.u32 %v272_v36, %v58_v24  ;;  %v73_v41 = vshll.u32 %v273_v39, %v58_v24  ;;  %vm76_vm4 = vcmp.lt.s32.totalorder %v307_v26, 1  ;;  %vm79_vm5 = vcmp.lt.s32.totalorder %v307_v26, 4 }
  0x93   :  { %v62_v32 = vshrl.u32 %v270_v30, %v305_v25  ;;  %v65_v34 = vshrl.u32 %v271_v33, %v305_v25  ;;  %v68_v37 = vshrl.u32 %v272_v36, %v305_v25  ;;  %v71_v40 = vshrl.u32 %v273_v39, %v305_v25 }
  0x94   :  { %v74_v43 = vshrl.u32 %v274_v42, %v305_v25  ;;  %vm78_vm6 = vcmp.lt.s32.totalorder %v307_v26, 3  ;;  %vm77_vm7 = vcmp.lt.s32.totalorder %v307_v26, 2  ;;  %v60_v23 = vshrl.u32 %v269_v28, %v305_v25 }
  0x95   :  { %v63_v44 = vor.u32 %v62_v32, %v61_v29  ;;  %v66_v45 = vor.u32 %v65_v34, %v64_v31  ;;  %v69_v46 = vor.u32 %v68_v37, %v67_v35  ;;  %v72_v47 = vor.u32 %v71_v40, %v70_v38 }
  0x96   :  { %v75_v48 = vor.u32 %v74_v43, %v73_v41 }
  0x97   :  { %v84_v50 = vsel %vm76_vm4, %v63_v44, %v66_v45  ;;  %v88_v51 = vsel %vm76_vm4, %v66_v45, %v69_v46  ;;  %v85_v52 = vsel %vm79_vm5, %v72_v47, 920167782  ;;  %v81_v19 = vsel %vm79_vm5, %v69_v46, 2102212464 }
  0x98   :  { %v89_v53 = vsel %vm79_vm5, %v75_v48, 1326507024  ;;  %v86_v54 = vsel %vm78_vm6, %v69_v46, %v85_v52  ;;  %v80_v32 = vsel %vm76_vm4, %v60_v23, %v63_v44  ;;  %v82_v33 = vsel %vm78_vm6, %v66_v45, %v81_v19 }
  0x99   :  { %v90_v55 = vsel %vm78_vm6, %v72_v47, %v89_v53  ;;  %v87_v56 = vsel %vm77_vm7, %v84_v50, %v86_v54  ;;  %v83_v25 = vsel %vm77_vm7, %v80_v32, %v82_v33  ;;  %vm187_vm4 = vweird.f32 %v298_v16 }
  0x9a   :  { %v91_v57 = vsel %vm77_vm7, %v88_v51, %v90_v55  ;;  %v117_v62 = vand.u32 65535, %v87_v56  ;;  %v118_v63 = vshrl.u32 %v87_v56, 16  ;;  %v137_v40 = vmul.u32 %v316_v49, %v83_v25 }
  0x9b   :  { %v95_v60 = vand.u32 65535, %v91_v57  ;;  %v96_v61 = vshrl.u32 %v91_v57, 16  ;;  %vm200_vm5 = vcmp.gt.f32.partialorder %v302_v20, 1.5707964 }
  0x9c   :  { %v120_v2 = vmul.u32 %v118_v63, %v93_v58  ;;  %v121_v4 = vmul.u32 %v117_v62, %v94_v59  ;;  %v119_v8 = vmul.u32 %v117_v62, %v93_v58  ;;  %v122_v12 = vmul.u32 %v118_v63, %v94_v59 }
  0x9d   :  { %v98_v0 = vmul.u32 %v96_v61, %v93_v58  ;;  %v99_v1 = vmul.u32 %v95_v60, %v94_v59  ;;  %v97_v5 = vmul.u32 %v95_v60, %v93_v58  ;;  %v100_v7 = vmul.u32 %v96_v61, %v94_v59 }
  0x9e   :  { %v123_v9 = vshll.u32 %v120_v2, 16  ;;  %v125_v14 = vshll.u32 %v121_v4, 16  ;;  %v124_v30 = vshrl.u32 %v120_v2, 16  ;;  %v126_v36 = vshrl.u32 %v121_v4, 16 }
  0x9f   :  { %v101_v6 = vshll.u32 %v98_v0, 16  ;;  %v103_v10 = vshll.u32 %v99_v1, 16  ;;  %v102_v24 = vshrl.u32 %v98_v0, 16  ;;  %v104_v34 = vshrl.u32 %v99_v1, 16 }
  0xa0   :  { %vm127_vm9 = vc.u32 %v119_v8, %v123_v9  ;;  %v129_v15 = vadd.s32 %v123_v9, %v119_v8 }
  0xa1   :  { %vm105_vm8 = vc.u32 %v97_v5, %v101_v6  ;;  %v107_v11 = vadd.s32 %v101_v6, %v97_v5  ;;  %v128_v18 = vsel %vm127_vm9, 1, %v267_v3 }
  0xa2   :  { %v106_v13 = vsel %vm105_vm8, 1, %v267_v3  ;;  %v130_v22 = vadd.s32 %v128_v18, %v122_v12  ;;  %vm131_vm11 = vc.u32 %v129_v15, %v125_v14  ;;  %v133_v39 = vadd.s32 %v129_v15, %v125_v14 }
  0xa3   :  { %v108_v17 = vadd.s32 %v106_v13, %v100_v7  ;;  %vm109_vm10 = vc.u32 %v107_v11, %v103_v10  ;;  %v132_v29 = vsel %vm131_vm11, 1, %v267_v3 }
  0xa4   :  { %v110_v21 = vsel %vm109_vm10, 1, %v267_v3  ;;  %v134_v31 = vadd.s32 %v132_v29, %v130_v22 }
  0xa5   :  { %v112_v27 = vadd.s32 %v110_v21, %v108_v17 }
  0xa6   :  { %v135_v37 = vadd.s32 %v134_v31, %v124_v30 }
  0xa7   :  { %v113_v35 = vadd.s32 %v112_v27, %v102_v24 }
  0xa8   :  { %v136_v28 = vadd.s32 %v135_v37, %v126_v36 }
  0xa9   :  { %v114_v38 = vadd.s32 %v113_v35, %v104_v34 }
  0xaa   :  { %v140_v3 = vadd.s32 1, %v136_v28 }
  0xab   :  { %vm139_vm12 = vc.u32 %v114_v38, %v133_v39  ;;  %v138_v26 = vadd.s32 %v133_v39, %v114_v38 }
  0xac   :  { %v141_v41 = vsel %vm139_vm12, %v140_v3, %v136_v28 }
  0xad   :  { %v142_v42 = vadd.s32 %v141_v41, %v137_v40 }
  0xaf   :  { %v143_v43 = vadd.s32 536870912, %v142_v42 }
  0xb1   :  { %v144_v44 = vshrl.u32 %v143_v43, 30 }
  0xb3   :  { %v145_v46 = vshll.u32 %v144_v44, 30  ;;  %v168_v6 = vsub.s32 4, %v144_v44 }
  0xb5   :  { %v146_v45 = vsub.s32 %v142_v42, %v145_v46  ;;  %v169_v11 = vsel %vm46_vm15, %v168_v6, %v144_v44 }
  0xb6   :  { %v171_v14 = vsel %vm45_vm0, 0, %v169_v11 }
  0xb7   :  { %vm147_vm13 = vcmp.lt.s32.totalorder %v146_v45, 0  ;;  %v148_v47 = vsub.s32 0, %v146_v45  ;;  %v188_v21 = vand.u32 3, %v171_v14 }
  0xb9   :  { %v149_v48 = vsel %vm147_vm13, %v148_v47, %v146_v45  ;;  %vm190_vm1 = vcmp.eq.s32.totalorder %v188_v21, 0  ;;  %vm193_vm2 = vcmp.eq.s32.totalorder %v188_v21, 2  ;;  %vm189_vm3 = vcmp.lt.s32.totalorder %v188_v21, 2 }
  0xba   :  { %v150_v50 = vclz %v149_v48 }
  0xbc   :  { %v220_v51 = vadd.s32 4294967294, %v150_v50 }
  0xbe   :  { %vm221_vm14 = vcmp.lt.s32.totalorder %v220_v51, 0 }
  0xbf   :  { %v153_v52 = vsel %vm221_vm14, 0, %v220_v51 }
  0xc0   :  { %v154_v53 = vsub.s32 32, %v153_v52  ;;  %v158_v54 = vsub.s32 4294967266, %v153_v52  ;;  %v155_v55 = vshll.u32 %v146_v45, %v153_v52 }
  0xc2   :  { %v156_v56 = vshrl.u32 %v138_v26, %v154_v53  ;;  %v159_v57 = vadd.s32 127, %v158_v54 }
  0xc4   :  { %v157_v49 = vor.u32 %v156_v56, %v155_v55  ;;  %v160_v58 = vshll.u32 %v159_v57, 23 }
  0xc6   :  { %v161_v59 = vor.u32 4788187, %v160_v58  ;;  %v164_v61 = vcvt.s32.f32 %v157_v49 }
  0xc8   :  { %v162_v60 = vand.u32 2147483647, %v161_v59 }
  0xca   :  { %v165_v62 = vmul.f32 %v164_v61, %v162_v60 }
  0xcc   :  { %v166_v63 = vxor.u32 2147483648, %v165_v62 }
  0xce   :  { %v167_v0 = vsel %vm46_vm15, %v166_v63, %v165_v62 }
  0xcf   :  { %v170_v1 = vsel %vm45_vm0, %v298_v16, %v167_v0 }
  0xd0   :  { %v172_v2 = vmul.f32 %v170_v1, %v170_v1 }
  0xd2   :  { %v173_v4 = vmul.f32 -0.001358992, %v172_v2  ;;  %v180_v5 = vmul.f32 -0.00019511016, %v172_v2 }
  0xd4   :  { %v174_v7 = vadd.f32 0.041655596, %v173_v4  ;;  %v181_v8 = vadd.f32 0.008332121, %v180_v5 }
  0xd6   :  { %v175_v9 = vmul.f32 %v174_v7, %v172_v2  ;;  %v182_v10 = vmul.f32 %v181_v8, %v172_v2 }
  0xd8   :  { %v176_v12 = vadd.f32 -0.4999988, %v175_v9  ;;  %v183_v13 = vadd.f32 -0.16666654, %v182_v10 }
  0xda   :  { %v177_v15 = vmul.f32 %v176_v12, %v172_v2  ;;  %v184_v17 = vmul.f32 %v183_v13, %v172_v2 }
  0xdc   :  { %v178_v18 = vadd.f32 1.0, %v177_v15  ;;  %v185_v19 = vadd.f32 1.0, %v184_v17 }
  0xde   :  { %v186_v22 = vmul.f32 %v185_v19, %v170_v1  ;;  %v194_v23 = vxor.u32 2147483648, %v178_v18 }
  0xe0   :  { %v191_v24 = vxor.u32 2147483648, %v186_v22  ;;  %v195_v29 = vsel %vm193_vm2, %v194_v23, %v186_v22 }
  0xe2   :  { %v192_v27 = vsel %vm190_vm1, %v178_v18, %v191_v24 }
  0xe3   :  { %v196_v30 = vsel %vm189_vm3, %v192_v27, %v195_v29 }
  0xe4   :  { %v197_v31 = vsel %vm187_vm4, nan, %v196_v30 }
  0xe5   :  { %v198_v32 = vmul.f32 %v197_v31, %v197_v31 }
  0xe7   :  { %v201_v33 = vsel %vm200_vm5, 0.0, %v198_v32 }
  0xe8   :  { %202 = vst [vmem:[#allocation2] sm:$0xff] %v201_v33 }
  0xe9   :  { %213 = dma.vmem_to_hbm [thread:$0]  %s209_s12, 128, %s211_s15, [#allocation3]  }
  0xea   :  { %263 = dma.done.wait [#allocation3], 128  }
  0xeb   :  { %264 = vsyncadd [#allocation3], 4294967168 }
  0xec   :  { %218 = vsyncpa [#allocation3], 1 }

</bundles_post_ra>
